<compile_context>
chip_gen: v7x
topology: tpu7x:2x2x1
jax: 0.10.0
libtpu: 0.0.40
codegen_flags: <defaults>
</compile_context>

<pallas_src>
import math

import jax
import jax.numpy as jnp
from jax.experimental import pallas as pl
from jax.experimental.pallas import tpu as pltpu

# ---------------- problem sizes (small, consistent with the module) ---------
STATE_DIM = 32
ACTION_DIM = 4
ACTOR_HIDDEN = 256
CRITIC_HIDDEN = 128
HEAD_ROWS = ACTOR_HIDDEN + CRITIC_HIDDEN        # 384
ACTION_STD_INIT = 0.6
BATCH = 16
LANE = 128                                      # lane-dense padding width

LOG_2PI = math.log(2.0 * math.pi)


# ---------------------------- Pallas kernel ---------------------------------
def evaluate_kernel(state_ref, action_ref, consts_ref,
                    w0_ref, aw1_ref, wtail_ref, out_ref):
    # constants slab (8, 384) f32, one logical vector per sublane row
    consts = consts_ref[...]
    b0 = consts[0:1, :]                                        # (1, 384)
    ab1 = consts[1:2, 0:ACTOR_HIDDEN]                          # (1, 256)
    cb1 = consts[1:2, ACTOR_HIDDEN:HEAD_ROWS]                  # (1, 128)
    head_b = consts[2:3, 0:LANE]                               # (1, 128)
    inv_var = consts[3:4, 0:LANE]                              # (1, 128)
    logp_const = consts[4:5, 0:1]                              # (1, 1)
    ent_const = consts[4:5, 1:2]                               # (1, 1)

    # ---- fused actor/critic layer 0: one MXU call for both towers ----
    x = state_ref[...].astype(jnp.bfloat16)                    # (B, 32)
    h0 = jnp.tanh(jnp.dot(x, w0_ref[...],
                          preferred_element_type=jnp.float32) + b0)
    h = h0[:, :ACTOR_HIDDEN].astype(jnp.bfloat16)              # (B, 256)
    c = h0[:, ACTOR_HIDDEN:].astype(jnp.bfloat16)              # (B, 128)

    # ---- layer 1 of each tower ----
    h = jnp.tanh(jnp.dot(h, aw1_ref[...],
                         preferred_element_type=jnp.float32) + ab1)
    cw1 = wtail_ref[0:CRITIC_HIDDEN, :]                        # (128, 128) bf16
    c = jnp.tanh(jnp.dot(c, cw1,
                         preferred_element_type=jnp.float32) + cb1)

    # ---- fused block-diagonal head: mean in cols 0..3, value in col 4 ----
    hc = jnp.concatenate([h.astype(jnp.bfloat16),
                          c.astype(jnp.bfloat16)], axis=-1)    # (B, 384)
    head_w = wtail_ref[CRITIC_HIDDEN:CRITIC_HIDDEN + HEAD_ROWS, :]
    hv = jnp.dot(hc, head_w,
                 preferred_element_type=jnp.float32) + head_b  # (B, 128)
    value = hv[:, ACTION_DIM:ACTION_DIM + 1]                   # (B, 1)
    # sigmoid via EUP tanh + VPU fma (no exp/divide); garbage in cols >= 4 is
    # masked out of the Mahalanobis term by inv_var == 0 there.
    mean = 0.5 * (jnp.tanh(0.5 * hv) + 1.0)                    # (B, 128)

    # ---- MultivariateNormal(mean, diag(var)) log_prob & entropy ----
    diff = action_ref[...] - mean                              # (B, 128)
    maha = jnp.sum(diff * diff * inv_var, axis=-1, keepdims=True)   # (B, 1)
    logp = -0.5 * maha + logp_const                            # (B, 1)

    # ---- pack [logp | value | entropy | 0...] into one lane-dense slab ----
    lane = jax.lax.broadcasted_iota(jnp.int32, out_ref.shape, 1)
    packed = jnp.where(lane == 0, logp, 0.0)
    packed = jnp.where(lane == 1, value, packed)
    packed = jnp.where(lane == 2, ent_const, packed)
    out_ref[...] = packed.astype(out_ref.dtype)


# ------------------------- one-time parameter packing ------------------------
def _pad_cols(a, n):
    return jnp.pad(a, ((0, 0), (0, n - a.shape[1])))


def pack_params(params, action_var):
    """Repack / fuse / cast the weights once (NOT per evaluate() call)."""
    (aw0, ab0, aw1, ab1, aw2, ab2,
     cw0, cb0, cw1, cb1, cw2, cb2) = params

    # fused layer-0 weight (S, 384): actor cols 0..255, critic cols 256..383
    w0 = jnp.concatenate([aw0, cw0], axis=1).astype(jnp.bfloat16)   # (32, 384)
    aw1_b = aw1.astype(jnp.bfloat16)                                # (256, 256)

    # block-diagonal fused head (384, 128):
    #   rows 0..255  / cols 0..3 : actor head aw2
    #   rows 256..383/ col  4    : critic head cw2
    head = jnp.zeros((HEAD_ROWS, LANE), jnp.float32)
    head = head.at[:ACTOR_HIDDEN, :ACTION_DIM].set(aw2)
    head = head.at[ACTOR_HIDDEN:, ACTION_DIM:ACTION_DIM + 1].set(cw2)
    # tail weight slab: cw1 stacked on top of the fused head -> one DMA
    w_tail = jnp.concatenate([cw1, head], axis=0).astype(jnp.bfloat16)  # (512,128)

    # constants slab (8, 384) f32, one logical vector per sublane row
    var = action_var[0]
    sum_log_var = jnp.sum(jnp.log(var))
    logp_const = -0.5 * (ACTION_DIM * LOG_2PI + sum_log_var)
    ent_const = 0.5 * ACTION_DIM * (1.0 + LOG_2PI) + 0.5 * sum_log_var
    consts = jnp.zeros((8, HEAD_ROWS), jnp.float32)
    consts = consts.at[0, :].set(jnp.concatenate([ab0, cb0], axis=1)[0])  # b0
    consts = consts.at[1, :ACTOR_HIDDEN].set(ab1[0])                      # ab1
    consts = consts.at[1, ACTOR_HIDDEN:HEAD_ROWS].set(cb1[0])             # cb1
    consts = consts.at[2, :ACTION_DIM].set(ab2[0])                        # head bias (actor)
    consts = consts.at[2, ACTION_DIM].set(cb2[0, 0])                      # head bias (critic)
    consts = consts.at[3, :ACTION_DIM].set(1.0 / var)                     # inv_var
    consts = consts.at[4, 0].set(logp_const).at[4, 1].set(ent_const)      # dist consts

    return (jax.device_put(w0), jax.device_put(aw1_b),
            jax.device_put(w_tail), jax.device_put(consts))


# ------------------------------ wrapper --------------------------------------
def evaluate(state, action, packed):
    """Returns (action_logprobs (B,), state_values (B,1), dist_entropy (B,))."""
    B = state.shape[0]
    w0, aw1_b, w_tail, consts = packed
    action_pad = _pad_cols(action, LANE)                        # (B, 128)

    flops = 2 * B * (STATE_DIM * HEAD_ROWS
                     + ACTOR_HIDDEN * ACTOR_HIDDEN
                     + CRITIC_HIDDEN * CRITIC_HIDDEN
                     + HEAD_ROWS * LANE)
    transcendentals = B * (HEAD_ROWS + ACTOR_HIDDEN + CRITIC_HIDDEN + LANE)
    bytes_accessed = (w0.size * 2 + aw1_b.size * 2 + w_tail.size * 2
                      + consts.size * 4
                      + state.size * 4 + action_pad.size * 4 + B * LANE * 4)

    vmem = pl.BlockSpec(memory_space=pltpu.MemorySpace.VMEM)
    out = pl.pallas_call(
        evaluate_kernel,
        out_shape=jax.ShapeDtypeStruct((B, LANE), jnp.float32),
        in_specs=[vmem] * 6,
        out_specs=vmem,
        cost_estimate=pl.CostEstimate(flops=flops,
                                      transcendentals=transcendentals,
                                      bytes_accessed=bytes_accessed),
    )(state, action_pad, consts, w0, aw1_b, w_tail)

    return out[:, 0], out[:, 1:2], out[:, 2]


# --------------------------- pure-JAX reference ------------------------------
def evaluate_ref(state, action, action_var, params):
    (aw0, ab0, aw1, ab1, aw2, ab2,
     cw0, cb0, cw1, cb1, cw2, cb2) = params
    h = jnp.tanh(state @ aw0 + ab0)
    h = jnp.tanh(h @ aw1 + ab1)
    mean = jax.nn.sigmoid(h @ aw2 + ab2)
    c = jnp.tanh(state @ cw0 + cb0)
    c = jnp.tanh(c @ cw1 + cb1)
    value = c @ cw2 + cb2
    var = action_var[0]
    diff = action - mean
    logp = (-0.5 * jnp.sum(diff * diff / var, axis=-1)
            - 0.5 * ACTION_DIM * LOG_2PI
            - 0.5 * jnp.sum(jnp.log(var)))
    ent = 0.5 * ACTION_DIM * (1.0 + LOG_2PI) + 0.5 * jnp.sum(jnp.log(var))
    ent = jnp.full_like(logp, ent)
    return logp, value, ent


# --------------------------- deterministic init -------------------------------
def init_linear(key, fan_in, fan_out):
    # PyTorch nn.Linear default: U(-1/sqrt(fan_in), 1/sqrt(fan_in)).
    kw, kb = jax.random.split(key)
    bound = 1.0 / math.sqrt(fan_in)
    w = jax.random.uniform(kw, (fan_in, fan_out), jnp.float32, -bound, bound)
    b = jax.random.uniform(kb, (1, fan_out), jnp.float32, -bound, bound)
    return w, b


if __name__ == "__main__":
    key = jax.random.PRNGKey(0)
    keys = jax.random.split(key, 8)

    aw0, ab0 = init_linear(keys[0], STATE_DIM, ACTOR_HIDDEN)
    aw1, ab1 = init_linear(keys[1], ACTOR_HIDDEN, ACTOR_HIDDEN)
    aw2, ab2 = init_linear(keys[2], ACTOR_HIDDEN, ACTION_DIM)
    cw0, cb0 = init_linear(keys[3], STATE_DIM, CRITIC_HIDDEN)
    cw1, cb1 = init_linear(keys[4], CRITIC_HIDDEN, CRITIC_HIDDEN)
    cw2, cb2 = init_linear(keys[5], CRITIC_HIDDEN, 1)
    params = (aw0, ab0, aw1, ab1, aw2, ab2,
              cw0, cb0, cw1, cb1, cw2, cb2)

    state = jax.random.normal(keys[6], (BATCH, STATE_DIM), jnp.float32)
    action = jax.random.uniform(keys[7], (BATCH, ACTION_DIM), jnp.float32)
    action_var = jnp.full((1, ACTION_DIM),
                          ACTION_STD_INIT * ACTION_STD_INIT, jnp.float32)

    # one-time packing (hoisted out of the per-call path)
    packed = pack_params(params, action_var)
    jax.block_until_ready(packed)

    logp, value, ent = evaluate(state, action, packed)
    jax.block_until_ready((logp, value, ent))

    logp_r, value_r, ent_r = evaluate_ref(state, action, action_var, params)
    # tolerances loosened for bf16 weights (reference stays f32)
    assert jnp.allclose(logp, logp_r, rtol=5e-2, atol=5e-2), "logprob mismatch"
    assert jnp.allclose(value, value_r, rtol=5e-2, atol=5e-2), "value mismatch"
    assert jnp.allclose(ent, ent_r, rtol=1e-5, atol=1e-5), "entropy mismatch"
    assert logp.shape == (BATCH,) and value.shape == (BATCH, 1) \
        and ent.shape == (BATCH,)

    print("KERNEL_OK")
</pallas_src>

<mosaic_0001>
module attributes {stable_mosaic.version = 11 : i64} {
  func.func @evaluate_kernel(%arg0: memref<16x32xf32, #tpu.memory_space<vmem>>, %arg1: memref<16x128xf32, #tpu.memory_space<vmem>>, %arg2: memref<8x384xf32, #tpu.memory_space<vmem>>, %arg3: memref<32x384xbf16, #tpu.memory_space<vmem>>, %arg4: memref<256x256xbf16, #tpu.memory_space<vmem>>, %arg5: memref<512x128xbf16, #tpu.memory_space<vmem>>, %arg6: memref<16x128xf32, #tpu.memory_space<vmem>>) attributes {dimension_semantics = [], scalar_prefetch = 0 : i64, scratch_operands = 0 : i64, tpu.core_type = #tpu.core_type<tc>} {
    %c0 = arith.constant 0 : index
    %c0_0 = arith.constant 0 : index
    %0 = vector.load %arg2[%c0, %c0_0] : memref<8x384xf32, #tpu.memory_space<vmem>>, vector<8x384xf32>
    %1 = vector.extract_strided_slice %0 {offsets = [0, 0], sizes = [1, 384], strides = [1, 1]} : vector<8x384xf32> to vector<1x384xf32>
    %2 = vector.extract_strided_slice %0 {offsets = [1, 0], sizes = [1, 256], strides = [1, 1]} : vector<8x384xf32> to vector<1x256xf32>
    %3 = vector.extract_strided_slice %0 {offsets = [1, 256], sizes = [1, 128], strides = [1, 1]} : vector<8x384xf32> to vector<1x128xf32>
    %4 = vector.extract_strided_slice %0 {offsets = [2, 0], sizes = [1, 128], strides = [1, 1]} : vector<8x384xf32> to vector<1x128xf32>
    %5 = vector.extract_strided_slice %0 {offsets = [3, 0], sizes = [1, 128], strides = [1, 1]} : vector<8x384xf32> to vector<1x128xf32>
    %6 = vector.extract_strided_slice %0 {offsets = [4, 0], sizes = [1, 1], strides = [1, 1]} : vector<8x384xf32> to vector<1x1xf32>
    %7 = vector.extract_strided_slice %0 {offsets = [4, 1], sizes = [1, 1], strides = [1, 1]} : vector<8x384xf32> to vector<1x1xf32>
    %c0_1 = arith.constant 0 : index
    %c0_2 = arith.constant 0 : index
    %8 = vector.load %arg0[%c0_1, %c0_2] : memref<16x32xf32, #tpu.memory_space<vmem>>, vector<16x32xf32>
    %9 = arith.truncf %8 : vector<16x32xf32> to vector<16x32xbf16>
    %c0_3 = arith.constant 0 : index
    %c0_4 = arith.constant 0 : index
    %10 = vector.load %arg3[%c0_3, %c0_4] : memref<32x384xbf16, #tpu.memory_space<vmem>>, vector<32x384xbf16>
    %cst = arith.constant dense<0.000000e+00> : vector<16x384xf32>
    %11 = tpu.matmul %9, %10, %cst {dimension_numbers = #tpu.dot_dimension_numbers<[1], [0], [0], [1], [0, 0, 1, 1], [], []>} : vector<16x32xbf16>, vector<32x384xbf16>, vector<16x384xf32> -> vector<16x384xf32>
    %12 = vector.broadcast %1 : vector<1x384xf32> to vector<16x384xf32>
    %13 = arith.addf %11, %12 : vector<16x384xf32>
    %14 = math.tanh %13 : vector<16x384xf32>
    %15 = vector.extract_strided_slice %14 {offsets = [0, 0], sizes = [16, 256], strides = [1, 1]} : vector<16x384xf32> to vector<16x256xf32>
    %16 = arith.truncf %15 : vector<16x256xf32> to vector<16x256xbf16>
    %17 = vector.extract_strided_slice %14 {offsets = [0, 256], sizes = [16, 128], strides = [1, 1]} : vector<16x384xf32> to vector<16x128xf32>
    %18 = arith.truncf %17 : vector<16x128xf32> to vector<16x128xbf16>
    %c0_5 = arith.constant 0 : index
    %c0_6 = arith.constant 0 : index
    %19 = vector.load %arg4[%c0_5, %c0_6] : memref<256x256xbf16, #tpu.memory_space<vmem>>, vector<256x256xbf16>
    %cst_7 = arith.constant dense<0.000000e+00> : vector<16x256xf32>
    %20 = tpu.matmul %16, %19, %cst_7 {dimension_numbers = #tpu.dot_dimension_numbers<[1], [0], [0], [1], [0, 0, 1, 1], [], []>} : vector<16x256xbf16>, vector<256x256xbf16>, vector<16x256xf32> -> vector<16x256xf32>
    %21 = vector.broadcast %2 : vector<1x256xf32> to vector<16x256xf32>
    %22 = arith.addf %20, %21 : vector<16x256xf32>
    %23 = math.tanh %22 : vector<16x256xf32>
    %c0_8 = arith.constant 0 : index
    %c0_9 = arith.constant 0 : index
    %24 = vector.load %arg5[%c0_8, %c0_9] : memref<512x128xbf16, #tpu.memory_space<vmem>>, vector<128x128xbf16>
    %cst_10 = arith.constant dense<0.000000e+00> : vector<16x128xf32>
    %25 = tpu.matmul %18, %24, %cst_10 {dimension_numbers = #tpu.dot_dimension_numbers<[1], [0], [0], [1], [0, 0, 1, 1], [], []>} : vector<16x128xbf16>, vector<128x128xbf16>, vector<16x128xf32> -> vector<16x128xf32>
    %26 = vector.broadcast %3 : vector<1x128xf32> to vector<16x128xf32>
    %27 = arith.addf %25, %26 : vector<16x128xf32>
    %28 = math.tanh %27 : vector<16x128xf32>
    %29 = arith.truncf %23 : vector<16x256xf32> to vector<16x256xbf16>
    %30 = arith.truncf %28 : vector<16x128xf32> to vector<16x128xbf16>
    %31 = tpu.concatenate %29, %30 in 1 : vector<16x256xbf16>, vector<16x128xbf16> -> vector<16x384xbf16>
    %c128 = arith.constant 128 : index
    %c0_11 = arith.constant 0 : index
    %32 = vector.load %arg5[%c128, %c0_11] : memref<512x128xbf16, #tpu.memory_space<vmem>>, vector<384x128xbf16>
    %cst_12 = arith.constant dense<0.000000e+00> : vector<16x128xf32>
    %33 = tpu.matmul %31, %32, %cst_12 {dimension_numbers = #tpu.dot_dimension_numbers<[1], [0], [0], [1], [0, 0, 1, 1], [], []>} : vector<16x384xbf16>, vector<384x128xbf16>, vector<16x128xf32> -> vector<16x128xf32>
    %34 = vector.broadcast %4 : vector<1x128xf32> to vector<16x128xf32>
    %35 = arith.addf %33, %34 : vector<16x128xf32>
    %36 = vector.extract_strided_slice %35 {offsets = [0, 4], sizes = [16, 1], strides = [1, 1]} : vector<16x128xf32> to vector<16x1xf32>
    %cst_13 = arith.constant 5.000000e-01 : f32
    %37 = vector.broadcast %cst_13 : f32 to vector<16x128xf32>
    %38 = arith.mulf %37, %35 : vector<16x128xf32>
    %39 = math.tanh %38 : vector<16x128xf32>
    %cst_14 = arith.constant 1.000000e+00 : f32
    %40 = vector.broadcast %cst_14 : f32 to vector<16x128xf32>
    %41 = arith.addf %39, %40 : vector<16x128xf32>
    %cst_15 = arith.constant 5.000000e-01 : f32
    %42 = vector.broadcast %cst_15 : f32 to vector<16x128xf32>
    %43 = arith.mulf %42, %41 : vector<16x128xf32>
    %c0_16 = arith.constant 0 : index
    %c0_17 = arith.constant 0 : index
    %44 = vector.load %arg1[%c0_16, %c0_17] : memref<16x128xf32, #tpu.memory_space<vmem>>, vector<16x128xf32>
    %45 = arith.subf %44, %43 : vector<16x128xf32>
    %46 = arith.mulf %45, %45 : vector<16x128xf32>
    %47 = vector.broadcast %5 : vector<1x128xf32> to vector<16x128xf32>
    %48 = arith.mulf %46, %47 : vector<16x128xf32>
    %cst_18 = arith.constant dense<0.000000e+00> : vector<16xf32>
    %49 = vector.multi_reduction <add>, %48, %cst_18 [1] : vector<16x128xf32> to vector<16xf32>
    %50 = vector.shape_cast %49 : vector<16xf32> to vector<16x1xf32>
    %cst_19 = arith.constant -5.000000e-01 : f32
    %51 = vector.broadcast %cst_19 : f32 to vector<16x1xf32>
    %52 = arith.mulf %51, %50 : vector<16x1xf32>
    %53 = vector.broadcast %6 : vector<1x1xf32> to vector<16x1xf32>
    %54 = arith.addf %52, %53 : vector<16x1xf32>
    %55 = tpu.iota {dimensions = array<i32: 1>} : vector<16x128xi32>
    %c0_i32 = arith.constant 0 : i32
    %56 = vector.broadcast %c0_i32 : i32 to vector<16x128xi32>
    %57 = arith.cmpi eq, %55, %56 : vector<16x128xi32>
    %cst_20 = arith.constant 0.000000e+00 : f32
    %58 = vector.shape_cast %54 : vector<16x1xf32> to vector<16x1xf32>
    %59 = vector.broadcast %58 : vector<16x1xf32> to vector<16x128xf32>
    %60 = vector.broadcast %cst_20 : f32 to vector<16x128xf32>
    %61 = arith.select %57, %59, %60 : vector<16x128xi1>, vector<16x128xf32>
    %c1_i32 = arith.constant 1 : i32
    %62 = vector.broadcast %c1_i32 : i32 to vector<16x128xi32>
    %63 = arith.cmpi eq, %55, %62 : vector<16x128xi32>
    %64 = vector.shape_cast %36 : vector<16x1xf32> to vector<16x1xf32>
    %65 = vector.broadcast %64 : vector<16x1xf32> to vector<16x128xf32>
    %66 = arith.select %63, %65, %61 : vector<16x128xi1>, vector<16x128xf32>
    %c2_i32 = arith.constant 2 : i32
    %67 = vector.broadcast %c2_i32 : i32 to vector<16x128xi32>
    %68 = arith.cmpi eq, %55, %67 : vector<16x128xi32>
    %69 = vector.shape_cast %7 : vector<1x1xf32> to vector<1x1xf32>
    %70 = vector.broadcast %69 : vector<1x1xf32> to vector<16x128xf32>
    %71 = arith.select %68, %70, %66 : vector<16x128xi1>, vector<16x128xf32>
    %c0_21 = arith.constant 0 : index
    %c0_22 = arith.constant 0 : index
    %72 = vector.load %arg6[%c0_21, %c0_22] : memref<16x128xf32, #tpu.memory_space<vmem>>, vector<16x128xf32>
    tpu.vector_store %arg6[%c0_21, %c0_22], %71 {strides = array<i32>} : memref<16x128xf32, #tpu.memory_space<vmem>>, vector<16x128xf32>,
    return
  }
}

</mosaic_0001>

<bundles_post_ra>
// kernel: tpu_custom_call.1
= control target key start
LH: loop header
LB: loop body
LE: loop exit
PB: predicated region body
PF: predicated region fallthrough
CT: control target
= control target key end

     0   :  { %11 = vsyncpa [#allocation3], 0  ;;  %s1672_s0 = inlined_call_operand.hbm [shape: f32[16,32], index: 0, kind: input, shape index: {}]   ;;  %s1673_s1 = inlined_call_operand.hbm [shape: f32[16,128], index: 1, kind: input, shape index: {}]   ;;  %s1674_s2 = inlined_call_operand.hbm [shape: f32[8,384], index: 2, kind: input, shape index: {}]   ;;  %s1675_s3 = inlined_call_operand.hbm [shape: bf16[32,384], index: 3, kind: input, shape index: {}]   ;;  %s1676_s4 = inlined_call_operand.hbm [shape: bf16[256,256], index: 4, kind: input, shape index: {}]   ;;  %s1677_s5 = inlined_call_operand.hbm [shape: bf16[512,128], index: 5, kind: input, shape index: {}]   ;;  %s1678_s6 = inlined_call_operand.hbm [shape: f32[16,128], index: 6, kind: output, shape index: {}]  }
   0x1   :  { %12 = vsyncpa [#allocation6], 0 }
   0x2   :  { %13 = vsyncpa [#allocation9], 0 }
   0x3   :  { %14 = vsyncpa [#allocation12], 0 }
   0x4   :  { %15 = vsyncpa [#allocation4], 0  ;;  %s1458_s21 = smov [#allocation5]   ;;  %s1459_s23 = smov [#allocation8]  }
   0x5   :  { %s33_s22 = sshll.u32 %s1458_s21, 4  ;;  %s55_s24 = sshll.u32 %s1459_s23, 4  ;;  %s34_s22 = int_to_ptr.vmem [resolvable:$true] %s33_s22  ;;  %s1511_s24 = int_to_ptr.vmem [resolvable:$true] %s55_s24 }
   0x6   :  { %s1294_s27 = scalar_lea.hbm %s1673_s1, 256 }
   0x7   :  { %p1295_p0 = scmp.ne.s32.totalorder %s1673_s1, %s1294_s27  ;;  %p1298_p1 = scmp.lt.u32.totalorder %s1294_s27, %s1673_s1 }
   0x9   :  { %p1300_p2 = pnand %p1298_p1, %p1295_p0 }
   0xb   :  { %1303 = shalt.err (!%p1300_p2)
}
   0xc   :  { %s1304_s8 = scalar_lea.vmem %s34_s22, 256  ;;  %p1309_p4 = scmp.lt.s32.totalorder %s34_s22, %s34_s22 }
   0xd   :  { %p1305_p3 = scmp.ne.s32.totalorder %s34_s22, %s1304_s8  ;;  %p1310_p5 = scmp.lt.s32.totalorder %s1304_s8, %s1304_s8 }
   0xf   :  { %p1311_p6 = por %p1310_p5, %p1309_p4 }
  0x11   :  { %p1312_p7 = pnand %p1311_p6, %p1305_p3 }
  0x13   :  { %1315 = shalt.err (!%p1312_p7)
}
  0x14   :  { %s1460_s9 = smov 128   ;;  %s1461_s10 = smov 8  }
  0x15   :  { %39 = dma.hbm_to_vmem [thread:$0]  %s1673_s1, 256, %s34_s22, [#allocation6], %s1460_s9, %s1460_s9, %s1461_s10  }
  0x16   :  { %s1316_s15 = scalar_lea.hbm %s1675_s3, 768 }
  0x17   :  { %p1317_p8 = scmp.ne.s32.totalorder %s1675_s3, %s1316_s15  ;;  %p1320_p9 = scmp.lt.u32.totalorder %s1316_s15, %s1675_s3 }
  0x19   :  { %p1322_p10 = pnand %p1320_p9, %p1317_p8 }
  0x1b   :  { %1325 = shalt.err (!%p1322_p10)
}
  0x1c   :  { %s1326_s20 = scalar_lea.vmem %s1511_s24, 768  ;;  %p1331_p12 = scmp.lt.s32.totalorder %s1511_s24, %s1511_s24 }
  0x1d   :  { %p1327_p11 = scmp.ne.s32.totalorder %s1511_s24, %s1326_s20  ;;  %p1332_p13 = scmp.lt.s32.totalorder %s1326_s20, %s1326_s20 }
  0x1f   :  { %p1333_p0 = por %p1332_p13, %p1331_p12 }
  0x21   :  { %p1334_p1 = pnand %p1333_p0, %p1327_p11 }
  0x23   :  { %1337 = shalt.err (!%p1334_p1)
}
  0x24   :  { %s1462_s1 = smov 192   ;;  %s1463_s21 = smov 12  }
  0x25   :  { %61 = dma.hbm_to_vmem [thread:$0]  %s1675_s3, 768, %s1511_s24, [#allocation9], %s1462_s1, %s1462_s1, %s1463_s21  }
  0x26   :  { %s1464_s25 = smov [#allocation2]   ;;  %s1465_s27 = smov [#allocation7]  }
  0x27   :  { %s21_s26 = sshll.u32 %s1464_s25, 4  ;;  %s46_s28 = sshll.u32 %s1465_s27, 4  ;;  %s22_s26 = int_to_ptr.vmem [resolvable:$true] %s21_s26  ;;  %s47_s28 = int_to_ptr.vmem [resolvable:$true] %s46_s28 }
  0x28   :  { %s1338_s7 = scalar_lea.hbm %s1672_s0, 256 }
  0x29   :  { %p1339_p2 = scmp.ne.s32.totalorder %s1672_s0, %s1338_s7  ;;  %p1342_p3 = scmp.lt.u32.totalorder %s1338_s7, %s1672_s0 }
  0x2b   :  { %p1344_p4 = pnand %p1342_p3, %p1339_p2 }
  0x2d   :  { %1347 = shalt.err (!%p1344_p4)
}
  0x2e   :  { %s1348_s3 = scalar_lea.vmem %s22_s26, 256  ;;  %p1353_p6 = scmp.lt.s32.totalorder %s22_s26, %s22_s26 }
  0x2f   :  { %p1349_p5 = scmp.ne.s32.totalorder %s22_s26, %s1348_s3  ;;  %p1354_p7 = scmp.lt.s32.totalorder %s1348_s3, %s1348_s3 }
  0x31   :  { %p1355_p8 = por %p1354_p7, %p1353_p6 }
  0x33   :  { %p1356_p9 = pnand %p1355_p8, %p1349_p5 }
  0x35   :  { %1359 = shalt.err (!%p1356_p9)
}
  0x36   :  { %27 = dma.hbm_to_vmem [thread:$0]  %s1672_s0, 256, %s22_s26, [#allocation3], %s1460_s9, %s1460_s9, %s1461_s10  }
  0x37   :  { %s1360_s17 = scalar_lea.hbm %s1674_s2, 384 }
  0x38   :  { %p1361_p10 = scmp.ne.s32.totalorder %s1674_s2, %s1360_s17  ;;  %p1364_p11 = scmp.lt.u32.totalorder %s1360_s17, %s1674_s2 }
  0x3a   :  { %p1366_p12 = pnand %p1364_p11, %p1361_p10 }
  0x3c   :  { %1369 = shalt.err (!%p1366_p12)
}
  0x3d   :  { %s1370_s21 = scalar_lea.vmem %s47_s28, 384  ;;  %p1375_p0 = scmp.lt.s32.totalorder %s47_s28, %s47_s28 }
  0x3e   :  { %p1371_p13 = scmp.ne.s32.totalorder %s47_s28, %s1370_s21  ;;  %p1376_p1 = scmp.lt.s32.totalorder %s1370_s21, %s1370_s21 }
  0x40   :  { %p1377_p2 = por %p1376_p1, %p1375_p0 }
  0x42   :  { %p1378_p3 = pnand %p1377_p2, %p1371_p13 }
  0x44   :  { %1381 = shalt.err (!%p1378_p3)
}
  0x45   :  { %49 = dma.hbm_to_vmem [thread:$0]  %s1674_s2, 384, %s47_s28, [#allocation6]  }
  0x46   :  { %s1466_s23 = smov [#allocation10]   ;;  %s1467_s26 = smov [#allocation11]  }
  0x47   :  { %s67_s25 = sshll.u32 %s1466_s23, 4  ;;  %s79_s27 = sshll.u32 %s1467_s26, 4  ;;  %s68_s25 = int_to_ptr.vmem [resolvable:$true] %s67_s25  ;;  %s1572_s27 = int_to_ptr.vmem [resolvable:$true] %s79_s27 }
  0x48   :  { %s1382_s7 = scalar_lea.hbm %s1676_s4, 4096 }
  0x49   :  { %p1383_p4 = scmp.ne.s32.totalorder %s1676_s4, %s1382_s7  ;;  %p1386_p5 = scmp.lt.u32.totalorder %s1382_s7, %s1676_s4 }
  0x4b   :  { %p1388_p6 = pnand %p1386_p5, %p1383_p4 }
  0x4d   :  { %1391 = shalt.err (!%p1388_p6)
}
  0x4e   :  { %s1392_s2 = scalar_lea.vmem %s68_s25, 4096  ;;  %p1397_p8 = scmp.lt.s32.totalorder %s68_s25, %s68_s25 }
  0x4f   :  { %p1393_p7 = scmp.ne.s32.totalorder %s68_s25, %s1392_s2  ;;  %p1398_p9 = scmp.lt.s32.totalorder %s1392_s2, %s1392_s2 }
  0x51   :  { %p1399_p10 = por %p1398_p9, %p1397_p8 }
  0x53   :  { %p1400_p11 = pnand %p1399_p10, %p1393_p7 }
  0x55   :  { %1403 = shalt.err (!%p1400_p11)
}
  0x56   :  { %73 = dma.hbm_to_vmem [thread:$0]  %s1676_s4, 4096, %s68_s25, [#allocation9], %s1460_s9, %s1460_s9, %s1461_s10  }
  0x57   :  { %s1404_s15 = scalar_lea.hbm %s1677_s5, 4096 }
  0x58   :  { %p1405_p12 = scmp.ne.s32.totalorder %s1677_s5, %s1404_s15  ;;  %p1408_p13 = scmp.lt.u32.totalorder %s1404_s15, %s1677_s5 }
  0x5a   :  { %p1410_p0 = pnand %p1408_p13, %p1405_p12 }
  0x5c   :  { %1413 = shalt.err (!%p1410_p0)
}
  0x5d   :  { %s1414_s20 = scalar_lea.vmem %s1572_s27, 4096  ;;  %p1419_p2 = scmp.lt.s32.totalorder %s1572_s27, %s1572_s27 }
  0x5e   :  { %p1415_p1 = scmp.ne.s32.totalorder %s1572_s27, %s1414_s20  ;;  %p1420_p3 = scmp.lt.s32.totalorder %s1414_s20, %s1414_s20 }
  0x60   :  { %p1421_p4 = por %p1420_p3, %p1419_p2 }
  0x62   :  { %p1422_p5 = pnand %p1421_p4, %p1415_p1 }
  0x64   :  { %1425 = shalt.err (!%p1422_p5)
}
  0x65   :  { %s1468_s4 = smov 64   ;;  %s1469_s1 = smov 4  }
  0x66   :  { %85 = dma.hbm_to_vmem [thread:$0]  %s1677_s5, 4096, %s1572_s27, [#allocation12], %s1468_s4, %s1468_s4, %s1469_s1  }
  0x67   :  { %1448 = dma.done.wait [#allocation3], 256  }
  0x68   :  { %1449 = vsyncadd [#allocation3], 4294967040 }
  0x69   :  { %1450 = dma.done.wait [#allocation6], 640  }
  0x6a   :  { %1451 = vsyncadd [#allocation6], 4294966656 }
  0x6b   :  { %1452 = dma.done.wait [#allocation9], 4864  }
  0x6c   :  { %1453 = vsyncadd [#allocation9], 4294962432 }
  0x6d   :  { %1454 = dma.done.wait [#allocation12], 4096  }
  0x6e   :  { %1455 = vsyncadd [#allocation12], 4294963200  ;;  %v1470_v0 = vmov 0   ;;  %v1178_v1 = vld [vmem:[#allocation8 + $0x4] ss:$12 sps:$4 sm:$0xff]   ;;  %v108_v5 = vld [vmem:[#allocation2] sm:$0xff]  ;;  %v119_v52 = vlaneseq }
  0x6f   :  { %199 = vmatprep.mubr.bf16.mxu1 %v1470_v0  ;;  %1174 = vset.pattern.permute.xlu1 %v1470_v0  ;;  %v1180_v2 = vld [vmem:[#allocation8] ss:$12 sps:$4 sm:$0xff]   ;;  %v1181_v3 = vld [vmem:[#allocation8 + $0x1c] ss:$12 sps:$4 sm:$0xff]   ;;  %v1183_v4 = vld [vmem:[#allocation8 + $0x18] ss:$12 sps:$4 sm:$0xff]  }
  0x70   :  { %1175 = vset.pattern.permute.xlu0 %v1470_v0  ;;  %167 = vmatprep.subr.bf16.mxu1 %v1178_v1  ;;  %v109_v6 = vld [vmem:[#allocation2 + $0x8] sm:$0xff]  ;;  %vm163_vm0 = vcmask 261120   ;;  %v1189_v11 = vld [vmem:[#allocation10 + $0x14] ss:$8 sps:$4 sm:$0xff]   ;;  %v1471_v12 = vmov 0.0   ;;  %vm1472_vm1 = vmmov 0  }
  0x71   :  { %168 = vmatpush1.bf16.msra.mxu1 %v1180_v2  ;;  %v110_v7 = vpack.c.bf16 %v109_v6, %v108_v5  ;;  %v1186_v8 = vld [vmem:[#allocation10 + $0x4] ss:$8 sps:$4 sm:$0xff]   ;;  %v1188_v9 = vld [vmem:[#allocation10] ss:$8 sps:$4 sm:$0xff]   ;;  %v1191_v13 = vld [vmem:[#allocation10 + $0x10] ss:$8 sps:$4 sm:$0xff]  }
  0x72   :  { %169 = vmatprep.subr.bf16.mxu1 %v1181_v3  ;;  %v1184_v10 = vld [vmem:[#allocation8 + $0x8] ss:$12 sps:$4 sm:$0xff]   ;;  %460 = vmatprep.subr.bf16.mxu0 %v1186_v8  ;;  %v1185_v15 = vld [vmem:[#allocation8 + $0x20] ss:$12 sps:$4 sm:$0xff]   ;;  %v1194_v16 = vld [vmem:[#allocation10 + $0x20] ss:$8 sps:$4 sm:$0xff]  }
  0x73   :  { %461 = vmatpush1.bf16.msra.mxu0 %v1188_v9  ;;  %v1192_v14 = vld [vmem:[#allocation10 + $0x24] ss:$8 sps:$4 sm:$0xff]   ;;  %v1195_v17 = vld [vmem:[#allocation10 + $0x34] ss:$8 sps:$4 sm:$0xff]   ;;  %v1197_v18 = vld [vmem:[#allocation10 + $0x30] ss:$8 sps:$4 sm:$0xff]  }
  0x74   :  { %462 = vmatprep.subr.bf16.mxu0 %v1189_v11  ;;  %v1198_v19 = vld [vmem:[#allocation10 + $0x44] ss:$8 sps:$4 sm:$0xff]   ;;  %v1200_v21 = vld [vmem:[#allocation10 + $0x40] ss:$8 sps:$4 sm:$0xff]   ;;  %v1201_v23 = vld [vmem:[#allocation10 + $0x54] ss:$8 sps:$4 sm:$0xff]  }
  0x75   :  { %170 = vmatpush1.bf16.msra.mxu1 %v1183_v4  ;;  %v1216_v20 = vld [vmem:[#allocation11] sm:$0xff]   ;;  %v1220_v22 = vld [vmem:[#allocation11 + $0x8] sm:$0xff]   ;;  %v1203_v24 = vld [vmem:[#allocation10 + $0x50] ss:$8 sps:$4 sm:$0xff]   ;;  %v1624_v53 = vshrl.u32 %v119_v52, 7  ;;  %s1473_s5 = smov 127  }
  0x76   :  { %1106 = vmatprep.subr.bf16.mxu1 %v1471_v12  ;;  %v1204_v25 = vld [vmem:[#allocation10 + $0x64] ss:$8 sps:$4 sm:$0xff]   ;;  %v1206_v26 = vld [vmem:[#allocation10 + $0x60] ss:$8 sps:$4 sm:$0xff]   ;;  %v1207_v27 = vld [vmem:[#allocation10 + $0x74] ss:$8 sps:$4 sm:$0xff]  }
  0x77   :  { %463 = vmatpush1.bf16.msra.mxu0 %v1191_v13  ;;  %v1209_v28 = vld [vmem:[#allocation10 + $0x70] ss:$8 sps:$4 sm:$0xff]   ;;  %v1210_v29 = vld [vmem:[#allocation10 + $0x84] ss:$8 sps:$4 sm:$0xff]   ;;  %v1212_v30 = vld [vmem:[#allocation10 + $0x80] ss:$8 sps:$4 sm:$0xff]  }
  0x78   :  { %997 = vmatmul.mubr.msk.bf16.vlgmr.msra.gmra.mrb[0].mxu1 %vm163_vm0, %v110_v7  ;;  %464 = vmatprep.subr.bf16.mxu0 %v1192_v14  ;;  %v1213_v31 = vld [vmem:[#allocation10 + $0x94] ss:$8 sps:$4 sm:$0xff]   ;;  %v1215_v32 = vld [vmem:[#allocation10 + $0x90] ss:$8 sps:$4 sm:$0xff]   ;;  %v1217_v33 = vld [vmem:[#allocation10 + $0xa4] ss:$8 sps:$4 sm:$0xff]  }
  0x79   :  { %1107 = vmatpush3.bf16.msra.mxu1 %v1184_v10  ;;  %1110 = vmatprep.mubr.msk.bf16.mxu1 %vm1472_vm1, %v1471_v12  ;;  %v1219_v34 = vld [vmem:[#allocation10 + $0xa0] ss:$8 sps:$4 sm:$0xff]   ;;  %v1221_v35 = vld [vmem:[#allocation10 + $0xb4] ss:$8 sps:$4 sm:$0xff]   ;;  %v1223_v36 = vld [vmem:[#allocation10 + $0xb0] ss:$8 sps:$4 sm:$0xff]  }
  0x7a   :  { %1108 = vmatprep.subr.bf16.mxu1 %v1471_v12  ;;  %v1224_v37 = vld [vmem:[#allocation11 + $0x10] sm:$0xff]   ;;  %v1225_v38 = vld [vmem:[#allocation10 + $0xc4] ss:$8 sps:$4 sm:$0xff]   ;;  %v1227_v39 = vld [vmem:[#allocation10 + $0xc0] ss:$8 sps:$4 sm:$0xff]   ;;  %v121_v54 = vsub.s32 0, %v1624_v53 }
  0x7b   :  { %465 = vmatpush1.bf16.msra.mxu0 %v1194_v16  ;;  %v1228_v40 = vld [vmem:[#allocation11 + $0x18] sm:$0xff]   ;;  %v1232_v43 = vld [vmem:[#allocation11 + $0x20] sm:$0xff]   ;;  %v1236_v46 = vld [vmem:[#allocation11 + $0x28] sm:$0xff]   ;;  %s1475_s23 = smov [#allocation13]  }
  0x7c   :  { %466 = vmatprep.subr.bf16.mxu0 %v1195_v17  ;;  %v1229_v41 = vld [vmem:[#allocation10 + $0xd4] ss:$8 sps:$4 sm:$0xff]   ;;  %v1231_v42 = vld [vmem:[#allocation10 + $0xd0] ss:$8 sps:$4 sm:$0xff]   ;;  %v1233_v44 = vld [vmem:[#allocation10 + $0xe4] ss:$8 sps:$4 sm:$0xff]  }
  0x7d   :  { %1109 = vmatpush3.bf16.msra.mxu1 %v1185_v15  ;;  %v1235_v45 = vld [vmem:[#allocation10 + $0xe0] ss:$8 sps:$4 sm:$0xff]   ;;  %v1237_v47 = vld [vmem:[#allocation10 + $0xf4] ss:$8 sps:$4 sm:$0xff]   ;;  %v1239_v48 = vld [vmem:[#allocation10 + $0xf0] ss:$8 sps:$4 sm:$0xff]  }
  0x7e   :  { %1114 = vmatprep.subr.bf16.mxu1 %v1471_v12  ;;  %v1240_v49 = vld [vmem:[#allocation11 + $0x30] sm:$0xff]   ;;  %v1241_v50 = vld [vmem:[#allocation11 + $0x38] sm:$0xff]   ;;  %v1242_v51 = vld [vmem:[#allocation11 + $0x80] sm:$0xff]   ;;  %s976_s25 = sshll.u32 %s1475_s23, 4  ;;  %s977_s25 = int_to_ptr.vmem [resolvable:$true] %s976_s25 }
  0x7f   :  { %467 = vmatpush1.bf16.msra.mxu0 %v1197_v18  ;;  %v1627_v55 = vld [vmem:[#allocation7] sm:$0xff]  ;;  %v1629_v56 = vld [vmem:[#allocation7 + $0x8] sm:$0xff]  ;;  %v1633_v0 = vld [vmem:[#allocation7 + $0x10] sm:$0xff]  ;;  %s1426_s26 = scalar_lea.vmem %s977_s25, 256  ;;  %p1431_p7 = scmp.lt.s32.totalorder %s977_s25, %s977_s25 }
  0x80   :  { %1111 = vmatmul.mubr.msk.bf16.vlgmr.msra.gmra.mrb[4].mxu1 %vm163_vm0, %v110_v7  ;;  %468 = vmatprep.subr.bf16.mxu0 %v1198_v19  ;;  %v122_v57 = vrot.slane %v1627_v55, %v121_v54  ;;  %v126_v58 = vrot.slane %v1629_v56, %v121_v54  ;;  %v130_v4 = vrot.slane %v1633_v0, %v121_v54  ;;  %v1246_v18 = vld [vmem:[#allocation11 + $0xc0] sm:$0xff]   ;;  %p1427_p6 = scmp.ne.s32.totalorder %s977_s25, %s1426_s26  ;;  %p1432_p8 = scmp.lt.s32.totalorder %s1426_s26, %s1426_s26 }
  0x81   :  { %1130 = vmatprep.mubr.msk.bf16.mxu1 %vm1472_vm1, %v1471_v12  ;;  %1115 = vmatpush3.bf16.msra.mxu1 %v1216_v20  ;;  %v1249_v20 = vld [vmem:[#allocation11 + $0xc8] sm:$0xff]  }
  0x82   :  { %1116 = vmatprep.subr.bf16.mxu1 %v1471_v12  ;;  %p1433_p9 = por %p1432_p8, %p1431_p7 }
  0x83   :  { %469 = vmatpush1.bf16.msra.mxu0 %v1200_v21 }
  0x84   :  { %470 = vmatprep.subr.bf16.mxu0 %v1201_v23  ;;  %p1434_p10 = pnand %p1433_p9, %p1427_p6 }
  0x85   :  { %1117 = vmatpush3.bf16.msra.mxu1 %v1220_v22  ;;  %v1243_v22 = vld [vmem:[#allocation11 + $0x40] sm:$0xff]  }
  0x86   :  { %1118 = vmatprep.subr.bf16.mxu1 %v1471_v12 }
  0x87   :  { %471 = vmatpush1.bf16.msra.mxu0 %v1203_v24  ;;  %v1244_v24 = vld [vmem:[#allocation11 + $0x88] sm:$0xff]  }
  0x88   :  { %472 = vmatprep.subr.bf16.mxu0 %v1204_v25  ;;  %v1245_v25 = vld [vmem:[#allocation11 + $0x48] sm:$0xff]  }
  0x89   :  { %1119 = vmatpush3.bf16.msra.mxu1 %v1224_v37  ;;  %v1259_v37 = vld [vmem:[#allocation11 + $0xb0] sm:$0xff]  }
  0x8a   :  { %1120 = vmatprep.subr.bf16.mxu1 %v1471_v12 }
  0x8b   :  { %473 = vmatpush1.bf16.msra.mxu0 %v1206_v26  ;;  %v1247_v26 = vld [vmem:[#allocation11 + $0x90] sm:$0xff]  }
  0x8c   :  { %474 = vmatprep.subr.bf16.mxu0 %v1207_v27  ;;  %v1248_v27 = vld [vmem:[#allocation11 + $0x50] sm:$0xff]  }
  0x8d   :  { %1121 = vmatpush3.bf16.msra.mxu1 %v1228_v40  ;;  %v1262_v40 = vld [vmem:[#allocation11 + $0xb8] sm:$0xff]  }
  0x8e   :  { %1122 = vmatprep.subr.bf16.mxu1 %v1471_v12 }
  0x8f   :  { %475 = vmatpush1.bf16.msra.mxu0 %v1209_v28  ;;  %v1250_v28 = vld [vmem:[#allocation11 + $0x98] sm:$0xff]  }
  0x90   :  { %476 = vmatprep.subr.bf16.mxu0 %v1210_v29  ;;  %v1251_v29 = vld [vmem:[#allocation11 + $0x58] sm:$0xff]  }
  0x91   :  { %1123 = vmatpush3.bf16.msra.mxu1 %v1232_v43  ;;  %v1265_v43 = vld [vmem:[#allocation11 + $0xf8] sm:$0xff]  }
  0x92   :  { %1124 = vmatprep.subr.bf16.mxu1 %v1471_v12 }
  0x93   :  { %477 = vmatpush1.bf16.msra.mxu0 %v1212_v30  ;;  %v1252_v30 = vld [vmem:[#allocation11 + $0xd0] sm:$0xff]  }
  0x94   :  { %478 = vmatprep.subr.bf16.mxu0 %v1213_v31  ;;  %v1253_v31 = vld [vmem:[#allocation11 + $0xa0] sm:$0xff]  }
  0x95   :  { %1125 = vmatpush3.bf16.msra.mxu1 %v1236_v46 }
  0x96   :  { %1126 = vmatprep.subr.bf16.mxu1 %v1471_v12 }
  0x97   :  { %479 = vmatpush1.bf16.msra.mxu0 %v1215_v32  ;;  %v1254_v32 = vld [vmem:[#allocation11 + $0x60] sm:$0xff]  }
  0x98   :  { %480 = vmatprep.subr.bf16.mxu0 %v1217_v33  ;;  %v1255_v33 = vld [vmem:[#allocation11 + $0xd8] sm:$0xff]  }
  0x99   :  { %1127 = vmatpush3.bf16.msra.mxu1 %v1240_v49 }
  0x9a   :  { %1128 = vmatprep.subr.bf16.mxu1 %v1471_v12 }
  0x9b   :  { %481 = vmatpush1.bf16.msra.mxu0 %v1219_v34  ;;  %v1256_v34 = vld [vmem:[#allocation11 + $0xa8] sm:$0xff]  }
  0x9c   :  { %482 = vmatprep.subr.bf16.mxu0 %v1221_v35  ;;  %v1257_v35 = vld [vmem:[#allocation11 + $0x68] sm:$0xff]  }
  0x9d   :  { %1129 = vmatpush3.bf16.msra.mxu1 %v1241_v50 }
  0x9e   :  { %1075 = vmatprep.subr.bf16.mxu1 %v1242_v51 }
  0x9f   :  { %483 = vmatpush1.bf16.msra.mxu0 %v1223_v36  ;;  %v1258_v36 = vld [vmem:[#allocation11 + $0xe0] sm:$0xff]  }
  0xa0   :  { %484 = vmatprep.subr.bf16.mxu0 %v1225_v38  ;;  %v1260_v38 = vld [vmem:[#allocation11 + $0x70] sm:$0xff]  }
  0xa3   :  { %485 = vmatpush1.bf16.msra.mxu0 %v1227_v39  ;;  %v1261_v39 = vld [vmem:[#allocation11 + $0xe8] sm:$0xff]  }
  0xa4   :  { %486 = vmatprep.subr.bf16.mxu0 %v1229_v41  ;;  %v1263_v41 = vld [vmem:[#allocation11 + $0x78] sm:$0xff]  }
  0xa7   :  { %487 = vmatpush1.bf16.msra.mxu0 %v1231_v42  ;;  %v1264_v42 = vld [vmem:[#allocation11 + $0xf0] sm:$0xff]  }
  0xa8   :  { %488 = vmatprep.subr.bf16.mxu0 %v1233_v44  ;;  %v294_v44 = vsub.s32 1, %v1624_v53 }
  0xaa   :  { %v299_v46 = vrot.slane %v1629_v56, %v294_v44 }
  0xab   :  { %489 = vmatpush1.bf16.msra.mxu0 %v1235_v45  ;;  %v295_v45 = vrot.slane %v1627_v55, %v294_v44 }
  0xac   :  { %490 = vmatprep.subr.bf16.mxu0 %v1237_v47 }
  0xaf   :  { %491 = vmatpush1.bf16.msra.mxu0 %v1239_v48 }
  0xb0   :  { %1134 = vmatprep.subr.bf16.mxu0 %v1471_v12 }
 0x14b   :  { %v201_v59 = vpop.f32.mrb[0].mxu1 }
 0x14c   :  { %v202_v60 = vadd.f32 %v201_v59, %v122_v57  ;;  %v203_v61 = vpop.f32.mrb[1].mxu1 }
 0x14d   :  { %v204_v62 = vadd.f32 %v203_v61, %v126_v58  ;;  %v205_v63 = vpop.f32.mrb[2].mxu1 }
 0x14e   :  { %1266 = vtanh.f32 %v202_v60  ;;  %v206_v1 = vadd.f32 %v205_v63, %v122_v57  ;;  %v207_v2 = vpop.f32.mrb[3].mxu1 }
 0x14f   :  { %1268 = vtanh.f32 %v204_v62  ;;  %v208_v3 = vadd.f32 %v207_v2, %v126_v58  ;;  %v526_v58 = vrot.slane %v1633_v0, %v294_v44 }
 0x150   :  { %1270 = vtanh.f32 %v206_v1 }
 0x151   :  { %1272 = vtanh.f32 %v208_v3 }
 0x153   :  { %v244_v5 = vpop.f32.mrb[4].mxu1 }
 0x154   :  { %v245_v6 = vadd.f32 %v244_v5, %v130_v4  ;;  %v1112_v7 = vpop.f32.mrb[5].mxu1 }
 0x155   :  { %v247_v8 = vpop.f32.mrb[6].mxu1 }
 0x156   :  { %1274 = vtanh.f32 %v245_v6  ;;  %v248_v9 = vadd.f32 %v247_v8, %v130_v4  ;;  %v1113_v10 = vpop.f32.mrb[7].mxu1 }
 0x157   :  { %v671_v10 = vsub.s32 2, %v1624_v53 }
 0x158   :  { %v1267_v11 = vpop.eup %1266  ;;  %1276 = vtanh.f32 %v248_v9  ;;  %v961_v9 = vrot.slane %v1627_v55, 4 }
 0x159   :  { %v1269_v13 = vpop.eup %1268 }
 0x15a   :  { %v1271_v14 = vpop.eup %1270  ;;  %962 = vrot.lane.b32.xlu1 %v961_v9, %s1473_s5 }
 0x15b   :  { %v1273_v15 = vpop.eup %1272  ;;  %v257_v16 = vpack.c.bf16 %v1271_v14, %v1267_v11 }
 0x15c   :  { %v258_v17 = vpack.c.bf16 %v1273_v15, %v1269_v13  ;;  %v672_v13 = vrot.slane %v1627_v55, %v671_v10 }
 0x15e   :  { %492 = vmatprep.mubr.bf16.mxu0 %v258_v17 }
 0x15f   :  { %493 = vmatmul.mubr.bf16.vlgmr.msra.gmra.mrb[0].mxu0 %v257_v16 }
 0x160   :  { %v1275_v19 = vpop.eup %1274  ;;  %1135 = vmatpush3.bf16.msra.mxu0 %v1246_v18  ;;  %1150 = vmatprep.mubr.msk.bf16.mxu0 %vm1472_vm1, %v1471_v12 }
 0x161   :  { %1136 = vmatprep.subr.bf16.mxu0 %v1471_v12 }
 0x162   :  { %v1277_v21 = vpop.eup %1276 }
 0x163   :  { %v259_v23 = vpack.c.bf16 %v1277_v21, %v1275_v19 }
 0x164   :  { %1137 = vmatpush3.bf16.msra.mxu0 %v1249_v20 }
 0x165   :  { %1131 = vmatmul.mubr.bf16.vlgmr.msra.gmra.mrb[8].mxu1 %v259_v23  ;;  %1138 = vmatprep.subr.bf16.mxu0 %v1471_v12 }
 0x166   :  { %1076 = vmatpush3.bf16.msra.mxu1 %v1243_v22 }
 0x167   :  { %1077 = vmatprep.subr.bf16.mxu1 %v1244_v24 }
 0x168   :  { %1139 = vmatpush3.bf16.msra.mxu0 %v1252_v30 }
 0x169   :  { %1140 = vmatprep.subr.bf16.mxu0 %v1471_v12 }
 0x16a   :  { %1078 = vmatpush3.bf16.msra.mxu1 %v1245_v25 }
 0x16b   :  { %1079 = vmatprep.subr.bf16.mxu1 %v1247_v26 }
 0x16c   :  { %1141 = vmatpush3.bf16.msra.mxu0 %v1255_v33  ;;  %v907_v33 = vld [vmem:[#allocation5] sm:$0xff] }
 0x16d   :  { %1142 = vmatprep.subr.bf16.mxu0 %v1471_v12 }
 0x16e   :  { %1080 = vmatpush3.bf16.msra.mxu1 %v1248_v27 }
 0x16f   :  { %1081 = vmatprep.subr.bf16.mxu1 %v1250_v28 }
 0x170   :  { %1143 = vmatpush3.bf16.msra.mxu0 %v1258_v36  ;;  %v908_v36 = vld [vmem:[#allocation5 + $0x8] sm:$0xff] }
 0x171   :  { %1144 = vmatprep.subr.bf16.mxu0 %v1471_v12 }
 0x172   :  { %1082 = vmatpush3.bf16.msra.mxu1 %v1251_v29 }
 0x173   :  { %1083 = vmatprep.subr.bf16.mxu1 %v1253_v31  ;;  %v915_v31 = vsub.s32 3, %v1624_v53 }
 0x174   :  { %1145 = vmatpush3.bf16.msra.mxu0 %v1261_v39 }
 0x175   :  { %1146 = vmatprep.subr.bf16.mxu0 %v1471_v12 }
 0x176   :  { %1084 = vmatpush3.bf16.msra.mxu1 %v1254_v32 }
 0x177   :  { %1085 = vmatprep.subr.bf16.mxu1 %v1256_v34 }
 0x178   :  { %1147 = vmatpush3.bf16.msra.mxu0 %v1264_v42 }
 0x179   :  { %1148 = vmatprep.subr.bf16.mxu0 %v1471_v12 }
 0x17a   :  { %1086 = vmatpush3.bf16.msra.mxu1 %v1257_v35 }
 0x17b   :  { %1087 = vmatprep.subr.bf16.mxu1 %v1259_v37 }
 0x17c   :  { %1149 = vmatpush3.bf16.msra.mxu0 %v1265_v43 }
 0x17e   :  { %1088 = vmatpush3.bf16.msra.mxu1 %v1260_v38  ;;  %v916_v38 = vrot.slane %v1627_v55, %v915_v31 }
 0x17f   :  { %1089 = vmatprep.subr.bf16.mxu1 %v1262_v40 }
 0x182   :  { %1090 = vmatpush3.bf16.msra.mxu1 %v1263_v41 }
 0x232   :  { %v494_v47 = vpop.f32.mrb[0].mxu0 }
 0x233   :  { %v495_v48 = vadd.f32 %v494_v47, %v295_v45  ;;  %v496_v49 = vpop.f32.mrb[1].mxu0 }
 0x234   :  { %v497_v50 = vadd.f32 %v496_v49, %v299_v46  ;;  %v498_v51 = vpop.f32.mrb[2].mxu0 }
 0x235   :  { %1278 = vtanh.f32 %v495_v48  ;;  %v499_v54 = vadd.f32 %v498_v51, %v295_v45  ;;  %v500_v57 = vpop.f32.mrb[3].mxu0  ;;  %v963_v45 = vpop.permute.xlu1 %962 }
 0x236   :  { %1280 = vtanh.f32 %v497_v50  ;;  %v501_v12 = vadd.f32 %v500_v57, %v299_v46  ;;  %1154 = vpush %v963_v45  ;;  %v927_v46 = vsub.s32 4, %v1624_v53 }
 0x237   :  { %1282 = vtanh.f32 %v499_v54 }
 0x238   :  { %1284 = vtanh.f32 %v501_v12  ;;  %v609_v59 = vpop.f32.mrb[8].mxu1  ;;  %v928_v47 = vrot.slane %v1627_v55, %v927_v46  ;;  %v932_v12 = vand.u32 127, %v119_v52 }
 0x239   :  { %v610_v60 = vadd.f32 %v609_v59, %v526_v58  ;;  %v1132_v61 = vpop.f32.mrb[9].mxu1 }
 0x23a   :  { %v612_v62 = vpop.f32.mrb[10].mxu1  ;;  %vm933_vm2 = vcmp.eq.s32.totalorder %v932_v12, 0  ;;  %vm946_vm3 = vcmp.eq.s32.totalorder %v932_v12, 1  ;;  %vm959_vm4 = vcmp.eq.s32.totalorder %v932_v12, 2 }
 0x23b   :  { %v613_v63 = vadd.f32 %v612_v62, %v526_v58  ;;  %v1133_v56 = vpop.f32.mrb[11].mxu1  ;;  %1286 = vtanh.f32 %v610_v60  ;;  %v1474_v58 = vmov 4  }
 0x23d   :  { %1288 = vtanh.f32 %v613_v63 }
 0x23f   :  { %v1279_v1 = vpop.eup %1278 }
 0x240   :  { %v1281_v2 = vpop.eup %1280 }
 0x241   :  { %v1283_v3 = vpop.eup %1282 }
 0x242   :  { %v1285_v4 = vpop.eup %1284  ;;  %v618_v5 = vpack.c.bf16 %v1283_v3, %v1279_v1 }
 0x243   :  { %v619_v6 = vpack.c.bf16 %v1285_v4, %v1281_v2 }
 0x245   :  { %849 = vmatprep.mubr.bf16.mxu1 %v619_v6  ;;  %v1287_v0 = vpop.eup %1286 }
 0x246   :  { %850 = vmatmul.mubr.bf16.vlgmr.msra.gmra.mrb[12].mxu1 %v618_v5 }
 0x247   :  { %v1289_v7 = vpop.eup %1288 }
 0x248   :  { %v620_v8 = vpack.c.bf16 %v1289_v7, %v1287_v0 }
 0x24a   :  { %1151 = vmatmul.mubr.bf16.vlgmr.msra.gmra.mrb[4].mxu0 %v620_v8 }
 0x267   :  { %s1155_s22 = spop %1154 }
 0x268   :  { %v965_v53 = vstv %s1155_s22 }
 0x319   :  { %v1091_v11 = vpop.f32.mrb[12].mxu1 }
 0x31a   :  { %v1092_v14 = vpop.f32.mrb[13].mxu1 }
 0x31b   :  { %v1093_v15 = vadd.f32 %v1092_v14, %v1091_v11  ;;  %v1094_v16 = vpop.f32.mrb[14].mxu1 }
 0x31c   :  { %v1095_v17 = vpop.f32.mrb[15].mxu1 }
 0x31d   :  { %v1096_v18 = vadd.f32 %v1095_v17, %v1094_v16  ;;  %v852_v19 = vadd.f32 %v1093_v15, %v672_v13  ;;  %v892_v20 = vpop.f32.mrb[4].mxu0 }
 0x31e   :  { %v1152_v21 = vpop.f32.mrb[5].mxu0 }
 0x31f   :  { %v893_v22 = vadd.f32 %v892_v20, %v852_v19  ;;  %v855_v23 = vadd.f32 %v1096_v18, %v672_v13  ;;  %v895_v24 = vpop.f32.mrb[6].mxu0 }
 0x320   :  { %v1153_v25 = vpop.f32.mrb[7].mxu0 }
 0x321   :  { %v899_v26 = vmul.f32 0.5, %v893_v22  ;;  %v896_v27 = vadd.f32 %v895_v24, %v855_v23 }
 0x323   :  { %1290 = vtanh.f32 %v899_v26  ;;  %v900_v28 = vmul.f32 0.5, %v896_v27 }
 0x325   :  { %1292 = vtanh.f32 %v900_v28 }
 0x32d   :  { %v1291_v29 = vpop.eup %1290 }
 0x32e   :  { %v903_v30 = vadd.f32 1.0, %v1291_v29 }
 0x32f   :  { %v1293_v32 = vpop.eup %1292 }
 0x330   :  { %v904_v34 = vadd.f32 1.0, %v1293_v32  ;;  %v905_v35 = vmul.f32 0.5, %v903_v30 }
 0x332   :  { %v909_v37 = vsub.f32 %v907_v33, %v905_v35  ;;  %v906_v39 = vmul.f32 0.5, %v904_v34 }
 0x334   :  { %v911_v40 = vmul.f32 %v909_v37, %v909_v37  ;;  %v910_v41 = vsub.f32 %v908_v36, %v906_v39 }
 0x336   :  { %v917_v42 = vmul.f32 %v916_v38, %v911_v40  ;;  %v912_v43 = vmul.f32 %v910_v41, %v910_v41 }
 0x338   :  { %919 = vadd.xlane.f32.xlu0 %v917_v42  ;;  %v918_v44 = vmul.f32 %v916_v38, %v912_v43 }
 0x33c   :  { %921 = vadd.xlane.f32.xlu0 %v918_v44 }
 0x3c5   :  { %v920_v48 = vpop.xlane.xlu0 %919 }
 0x3c6   :  { %v923_v49 = vmul.f32 -0.5, %v920_v48 }
 0x3c8   :  { %v929_v50 = vadd.f32 %v928_v47, %v923_v49 }
 0x3c9   :  { %v922_v51 = vpop.xlane.xlu0 %921 }
 0x3ca   :  { %v924_v54 = vmul.f32 -0.5, %v922_v51  ;;  %936 = vperm.xlu1 %1174, %v929_v50  }
 0x3cc   :  { %v930_v57 = vadd.f32 %v928_v47, %v924_v54 }
 0x3ce   :  { %1176 = vset.pattern.permute.xlu1 %v1474_v58  ;;  %941 = vperm.xlu0 %1175, %v930_v57  }
 0x3cf   :  { %949 = vperm.xlu1 %1176, %v893_v22  }
 0x3d2   :  { %1177 = vset.pattern.permute.xlu0 %v1474_v58 }
 0x3d3   :  { %954 = vperm.xlu1 %1176, %v896_v27  }
 0x449   :  { %v937_v59 = vpop.permute.xlu1 %936 }
 0x44a   :  { %v944_v55 = vsel %vm933_vm2, %v937_v59, 0.0 }
 0x44d   :  { %v942_v61 = vpop.permute.xlu0 %941 }
 0x44e   :  { %v950_v60 = vpop.permute.xlu1 %949  ;;  %v945_v56 = vsel %vm933_vm2, %v942_v61, 0.0 }
 0x44f   :  { %v957_v62 = vsel %vm946_vm3, %v950_v60, %v944_v55 }
 0x450   :  { %v967_v63 = vsel %vm959_vm4, %v965_v53, %v957_v62 }
 0x451   :  { %969 = vst [vmem:[#allocation13] sm:$0xff] %v967_v63 }
 0x452   :  { %v955_v1 = vpop.permute.xlu1 %954 }
 0x453   :  { %v958_v2 = vsel %vm946_vm3, %v955_v1, %v945_v56 }
 0x454   :  { %v968_v3 = vsel %vm959_vm4, %v965_v53, %v958_v2 }
 0x455   :  { %970 = vst [vmem:[#allocation13 + $0x8] sm:$0xff] %v968_v3 }
 0x456   :  { %1437 = shalt.err (!%p1434_p10)
}
 0x457   :  { %s1438_s30 = scalar_lea.hbm %s1678_s6, 256 }
 0x458   :  { %p1439_p11 = scmp.ne.s32.totalorder %s1678_s6, %s1438_s30  ;;  %p1442_p12 = scmp.lt.u32.totalorder %s1438_s30, %s1678_s6 }
 0x45a   :  { %p1444_p13 = pnand %p1442_p12, %p1439_p11 }
 0x45c   :  { %1447 = shalt.err (!%p1444_p13)
}
 0x45d   :  { %982 = dma.vmem_to_hbm [thread:$0]  %s977_s25, 256, %s1678_s6, [#allocation4], %s1460_s9, %s1460_s9, %s1461_s10  }
 0x45e   :  { %1456 = dma.done.wait [#allocation4], 256  }
 0x45f   :  { %1457 = vsyncadd [#allocation4], 4294967040 }
 0x460   :  { %986 = vsyncpa [#allocation3], 1 }
 0x461   :  { %987 = vsyncpa [#allocation6], 1 }
 0x462   :  { %988 = vsyncpa [#allocation9], 1 }
 0x463   :  { %989 = vsyncpa [#allocation12], 1 }
 0x464   :  { %990 = vsyncpa [#allocation4], 1 }

</bundles_post_ra>
